<compile_context>
chip_gen: v7x
topology: tpu7x:2x2x1
jax: 0.10.0
libtpu: 0.0.40
codegen_flags: <defaults>
</compile_context>

<pallas_src>
import jax
import jax.numpy as jnp
from jax.experimental import pallas as pl
from jax.experimental.pallas import tpu as pltpu


_LANE = 128                   # vreg/MXU lane width: folded weight padded to this.
_MAX_BLOCK_B = 1024           # largest batch tile (multiple of 8); past the pipelining knee.
_SMALL_BATCH_FASTPATH = 128   # below this, skip pallas_call and use plain XLA.


def _round_up(x, m):
    return ((x + m - 1) // m) * m


def _affine_kernel(x_ref, w_ref, b_ref, o_ref):
    """One MXU matmul on the lane-dense padded weight; store only the real T columns."""
    t = o_ref.shape[-1]
    x = x_ref[...]
    if x.dtype != w_ref.dtype:
        # In-kernel cast (VPU has huge slack); x is read from HBM in its native dtype.
        x = x.astype(w_ref.dtype)
    acc = jnp.dot(x, w_ref[...], preferred_element_type=jnp.float32)   # (blk, t_pad) f32
    o_ref[...] = (acc[:, :t] + b_ref[...]).astype(o_ref.dtype)         # narrow, masked vst


def fold_params(w1, b1, w2, b2, w3, b3, *, compute_dtype=jnp.float32):
    """Collapse the 3 affine layers into one map.  Call ONCE per weight set and cache.

    Returns:
      w_pad : (E, 128*ceil(T/128)) in `compute_dtype`, zero-padded so the MXU
              operand is lane-dense,
      b_eff : (1, T) float32 folded bias.
    """
    E = w1.shape[0]
    T = w3.shape[1]
    hi = jax.lax.Precision.HIGHEST
    w_eff = jnp.dot(jnp.dot(w1, w2, precision=hi), w3, precision=hi)            # (E, T)
    b_eff = jnp.dot(jnp.dot(b1, w2, precision=hi) + b2, w3, precision=hi) + b3  # (1, T)
    t_pad = _round_up(max(T, _LANE), _LANE)
    w_pad = jnp.zeros((E, t_pad), jnp.float32).at[:, :T].set(w_eff)
    return w_pad.astype(compute_dtype), b_eff.astype(jnp.float32)


def _pick_block_b(B):
    """Batch tile size: big tiles, multiple of 8, even balanced split for v7x's 2 TCs."""
    if B <= _SMALL_BATCH_FASTPATH:
        return B                       # single tile (full dim -> legal even if not %8)
    n_tiles = max(2, pl.cdiv(B, _MAX_BLOCK_B))
    if n_tiles % 2:
        n_tiles += 1                   # even tile count -> balanced across 2 TensorCores
    return min(_MAX_BLOCK_B, _round_up(pl.cdiv(B, n_tiles), 8))


@jax.jit
def _pallas_forward(x, w_pad, b_eff):
    B, E = x.shape
    T = b_eff.shape[-1]
    t_pad = w_pad.shape[-1]
    block_b = _pick_block_b(B)
    grid = (pl.cdiv(B, block_b),)

    return pl.pallas_call(
        _affine_kernel,
        out_shape=jax.ShapeDtypeStruct((B, T), x.dtype),
        grid=grid,
        in_specs=[
            pl.BlockSpec((block_b, E), lambda i: (i, 0)),   # x tile, native dtype (f32)
            pl.BlockSpec((E, t_pad), lambda i: (0, 0)),     # folded W, lane-dense, resident
            pl.BlockSpec((1, T), lambda i: (0, 0)),         # folded bias (full array)
        ],
        # Out block covers the full last dim (T), so each tile is one contiguous DMA
        # and no padded slab / wrapper slice pass is needed.
        out_specs=pl.BlockSpec((block_b, T), lambda i: (i, 0)),
        compiler_params=pltpu.CompilerParams(
            dimension_semantics=("parallel",),
            # ~7 MiB peak even at block_b=1024 with f32 x; leave ample headroom
            # under v7x's 64 MiB physical VMEM.
            vmem_limit_bytes=32 * 1024 * 1024,
        ),
    )(x, w_pad, b_eff)


@jax.jit
def _jnp_fastpath(x, w_pad, b_eff):
    T = b_eff.shape[-1]
    hi = jax.lax.Precision.HIGHEST
    return jnp.dot(x, w_pad[:, :T].astype(x.dtype), precision=hi) + b_eff


def trilinear_head_forward(x, w_pad, b_eff, *,
                           small_batch_threshold=_SMALL_BATCH_FASTPATH):
    """x: (B, E) f32; w_pad/b_eff from fold_params().  Returns (B, targetsize) f32."""
    if x.shape[0] < small_batch_threshold:
        return _jnp_fastpath(x, w_pad, b_eff)
    return _pallas_forward(x, w_pad, b_eff)


def init_params(key, embed_dimension=768, targetsize=2):
    """Deterministic synthetic init mimicking torch.nn.Linear's U(-1/sqrt(in), 1/sqrt(in))."""
    dims = [(embed_dimension, 256), (256, 64), (64, targetsize)]
    params = []
    for (fan_in, fan_out) in dims:
        key, kw, kb = jax.random.split(key, 3)
        bound = 1.0 / jnp.sqrt(fan_in)
        w = jax.random.uniform(kw, (fan_in, fan_out), jnp.float32, -bound, bound)
        b = jax.random.uniform(kb, (1, fan_out), jnp.float32, -bound, bound)
        params += [w, b]
    return params


def reference_forward(x, w1, b1, w2, b2, w3, b3):
    # Sequential 3-layer affine, matching the PyTorch forward (no sigmoid applied).
    hi = jax.lax.Precision.HIGHEST
    h1 = jnp.dot(x, w1, precision=hi) + b1
    h2 = jnp.dot(h1, w2, precision=hi) + b2
    return jnp.dot(h2, w3, precision=hi) + b3


if __name__ == "__main__":
    key = jax.random.PRNGKey(0)
    key, kx = jax.random.split(key)

    # batch > fast-path threshold so the Pallas kernel runs; not a multiple of the
    # tile size so the masked partial last tile is exercised too.
    batch = 200
    embed_dimension = 768
    targetsize = 2

    x = jax.random.normal(kx, (batch, embed_dimension), jnp.float32)
    w1, b1, w2, b2, w3, b3 = init_params(key, embed_dimension, targetsize)

    # Fold once per weight set (hoisted out of the forward), then reuse across calls.
    w_pad, b_eff = fold_params(w1, b1, w2, b2, w3, b3)
    w_pad, b_eff = jax.block_until_ready((w_pad, b_eff))

    out = trilinear_head_forward(x, w_pad, b_eff)
    out = jax.block_until_ready(out)

    ref = reference_forward(x, w1, b1, w2, b2, w3, b3)
    assert out.shape == (batch, targetsize), out.shape
    # Everything is f32 end to end now; only f32-matmul rounding differs.
    assert jnp.allclose(out, ref, atol=5e-3, rtol=5e-3), "pallas path mismatch"

    # Small-batch fast path (plain XLA below the threshold) stays consistent.
    out_small = trilinear_head_forward(x[:8], w_pad, b_eff)
    out_small = jax.block_until_ready(out_small)
    assert jnp.allclose(out_small, ref[:8], atol=5e-3, rtol=5e-3), "fastpath mismatch"

    print("KERNEL_OK")
</pallas_src>

<mosaic_0001>
module attributes {stable_mosaic.version = 11 : i64} {
  func.func @_affine_kernel(%arg0: i32, %arg1: memref<104x768xf32, #tpu.memory_space<vmem>>, %arg2: memref<768x128xf32, #tpu.memory_space<vmem>>, %arg3: memref<1x2xf32, #tpu.memory_space<vmem>>, %arg4: memref<104x2xf32, #tpu.memory_space<vmem>>) attributes {dimension_semantics = [#tpu.dimension_semantics<parallel>], iteration_bounds = array<i64: 2>, scalar_prefetch = 0 : i64, scratch_operands = 0 : i64, tpu.core_type = #tpu.core_type<tc>, window_params = [{transform_indices = @transform_0, window_bounds = array<i64: 104, 768>}, {pipeline_mode = #tpu.pipeline_mode<synchronous>, transform_indices = @transform_1, window_bounds = array<i64: 768, 128>}, {pipeline_mode = #tpu.pipeline_mode<synchronous>, transform_indices = @transform_2, window_bounds = array<i64: 1, 2>}, {transform_indices = @transform_3, window_bounds = array<i64: 104, 2>}]} {
    %c0 = arith.constant 0 : index
    %c0_0 = arith.constant 0 : index
    %0 = vector.load %arg1[%c0, %c0_0] : memref<104x768xf32, #tpu.memory_space<vmem>>, vector<104x768xf32>
    %c0_1 = arith.constant 0 : index
    %c0_2 = arith.constant 0 : index
    %1 = vector.load %arg2[%c0_1, %c0_2] : memref<768x128xf32, #tpu.memory_space<vmem>>, vector<768x128xf32>
    %cst = arith.constant dense<0.000000e+00> : vector<104x128xf32>
    %2 = tpu.matmul %0, %1, %cst {dimension_numbers = #tpu.dot_dimension_numbers<[1], [0], [0], [1], [0, 0, 1, 1], [], []>} : vector<104x768xf32>, vector<768x128xf32>, vector<104x128xf32> -> vector<104x128xf32>
    %3 = vector.extract_strided_slice %2 {offsets = [0, 0], sizes = [104, 2], strides = [1, 1]} : vector<104x128xf32> to vector<104x2xf32>
    %c0_3 = arith.constant 0 : index
    %c0_4 = arith.constant 0 : index
    %4 = vector.load %arg3[%c0_3, %c0_4] : memref<1x2xf32, #tpu.memory_space<vmem>>, vector<1x2xf32>
    %5 = vector.broadcast %4 : vector<1x2xf32> to vector<104x2xf32>
    %6 = arith.addf %3, %5 : vector<104x2xf32>
    %c0_5 = arith.constant 0 : index
    %c0_6 = arith.constant 0 : index
    %7 = vector.load %arg4[%c0_5, %c0_6] : memref<104x2xf32, #tpu.memory_space<vmem>>, vector<104x2xf32>
    tpu.vector_store %arg4[%c0_5, %c0_6], %6 {strides = array<i32>} : memref<104x2xf32, #tpu.memory_space<vmem>>, vector<104x2xf32>,
    return
  }
  func.func @transform_0(%arg0: i32) -> (i32, i32) {
    %c0_i32 = arith.constant 0 : i32
    %c0_i32_0 = arith.constant 0 : i32
    return %arg0, %c0_i32 : i32, i32
  }
  func.func @transform_1(%arg0: i32) -> (i32, i32) {
    %c0_i32 = arith.constant 0 : i32
    %c0_i32_0 = arith.constant 0 : i32
    %c0_i32_1 = arith.constant 0 : i32
    return %c0_i32, %c0_i32_0 : i32, i32
  }
  func.func @transform_2(%arg0: i32) -> (i32, i32) {
    %c0_i32 = arith.constant 0 : i32
    %c0_i32_0 = arith.constant 0 : i32
    %c0_i32_1 = arith.constant 0 : i32
    return %c0_i32, %c0_i32_0 : i32, i32
  }
  func.func @transform_3(%arg0: i32) -> (i32, i32) {
    %c0_i32 = arith.constant 0 : i32
    %c0_i32_0 = arith.constant 0 : i32
    return %arg0, %c0_i32 : i32, i32
  }
}

</mosaic_0001>

<bundles_post_ra>
// kernel: _pallas_forward.1
= control target key start
LH: loop header
LB: loop body
LE: loop exit
PB: predicated region body
PF: predicated region fallthrough
CT: control target
= control target key end

     0   :  { %8 = vsyncpa [#allocation3], 0  ;;  %s2147_s0 = inlined_call_operand.hbm [shape: f32[200,768], index: 0, kind: input, shape index: {}]   ;;  %s2148_s1 = inlined_call_operand.hbm [shape: f32[768,128], index: 1, kind: input, shape index: {}]   ;;  %s2149_s2 = inlined_call_operand.vmem [shape: f32[1,2], index: 2, kind: input, shape index: {}]   ;;  %s2150_s3 = inlined_call_operand.vmem [shape: f32[200,2], index: 3, kind: output, shape index: {}]  }
   0x1   :  { %10 = vsyncpa [#allocation3 + $0x1], 0 }
   0x2   :  { %11 = vsyncpa [#allocation5], 0  ;;  %s1761_s12 = smov 0   ;;  %s1763_s13 = smov 0  }
   0x3   :  { %s1765_s14 = smov 0   ;;  %s1767_s15 = smov 0  }
   0x4 LB: > { %s1780_s16 = sadd.s32 4294967295, %s1701_s15   ;;  %s1783_s17 = sadd.s32 1, %s1701_s15   ;;  %s1701_s15 = sphi %s1767_s15, %s2171_s15   ;;  %s1697_s14 = sphi %s1765_s14, %s2170_s14   ;;  %s1693_s13 = sphi %s1763_s13, %s2169_s13   ;;  %s1689_s12 = sphi %s1761_s12, %s2168_s12  }
   0x5   : > { %s21_s18 = ssub.s32 %s1701_s15, %s1783_s17  ;;  %s24_s19 = sadd.s32 1, %s1697_s14 }
   0x6   : > { %p22_p0 = scmp.eq.s32.totalorder %s21_s18, 0  ;;  %p31_p1 = scmp.ne.s32.totalorder %s1697_s14, %s1693_s13 }
   0x7   : > { %p32_p2 = scmp.eq.s32.totalorder %s1701_s15, 0  ;;  %p37_p3 = scmp.ne.s32.totalorder %s1693_s13, %s1689_s12 }
   0x8   : > { %s1793_s20 = scalar_select %p22_p0, %s1697_s14, %s24_s19  }
   0x9   : > { %p1795_p4 = por %p32_p2, %p31_p1  ;;  %p2151_p5 = scmp.eq.s32.totalorder %s1780_s16, 0 }
   0xa   : > { %p103_p6 = scmp.eq.s32.totalorder %s1780_s16, 1  ;;  %p1104_p7 = scmp.ge.s32.totalorder %s1701_s15, 1 }
   0xb   : > { %s2154_s21 = scalar_select %p1795_p4, 1, 0 }
   0xc   : > { %p1804_p8 = por %p2151_p5, %p37_p3  ;;  %p116_p9 = scmp.lt.s32.totalorder %s1701_s15, 3 }
   0xd   : > { %p1809_p10 = por %p103_p6, %p31_p1  ;;  %s1735_s25 = smov [#allocation4]  }
   0xe   : > { %s2155_s22 = scalar_select %p1804_p8, 1, 0 }
   0xf   : > { %s2156_s23 = scalar_select %p1809_p10, 1, 0 }
  0x10   : > { %p1813_p11 = pnand %p1104_p7, %p116_p9  ;;  %s128_s26 = sshll.u32 %s1735_s25, 4  ;;  %s129_s26 = int_to_ptr.vmem [resolvable:$true] %s128_s26 }
  0x11   : > { %s1575_s30 = scalar_lea.hbm %s2148_s1, 12288 }
  0x12   : > { %s2157_s24 = scalar_select %p1813_p11, 1, 0 }
  0x13   : > { %p1462_p12 = pneg %p1813_p11  ;;  %p1576_p0 = scmp.ne.s32.totalorder %s2148_s1, %s1575_s30 }
  0x14   : > { %p1582_p6 = scmp.lt.u32.totalorder %s1575_s30, %s2148_s1 }
  0x15   : > { %p1821_p13 = pnand %p1462_p12, %p2151_p5 }
  0x17   : > { %p1577_p1 = pneg %p1821_p13 }
  0x19   : > { %p1578_p2 = pnand %p1577_p1, %p1576_p0 }
  0x1b   : > { %p1579_p3 = pneg %p1578_p2 }
  0x1d   : > { %p1584_p7 = pnand %p1582_p6, %p1579_p3 }
  0x1f   : > { %1587 = shalt.err (!%p1584_p7)
}
  0x20   : > { %s1588_s8 = scalar_lea.vmem %s129_s26, 12288  ;;  %p1596_p10 = scmp.lt.s32.totalorder %s129_s26, %s129_s26 }
  0x21   : > { %p1589_p9 = scmp.ne.s32.totalorder %s129_s26, %s1588_s8  ;;  %p1597_p8 = scmp.lt.s32.totalorder %s1588_s8, %s1588_s8 }
  0x23   : > { %p1591_p12 = pnand %p1589_p9, %p1577_p1  ;;  %p1598_p11 = por %p1597_p8, %p1596_p10 }
  0x25   : > { %p1592_p5 = pneg %p1591_p12 }
  0x27   : > { %p1599_p4 = pnand %p1598_p11, %p1592_p5 }
  0x29   : > { %1602 = shalt.err (!%p1599_p4)
}
  0x2a   : > { %s1736_s9 = smov 128   ;;  %s1737_s10 = smov 8  }
  0x2b   : > { %1465 = dma.hbm_to_vmem [thread:$0]  (!%p1821_p13), %s2148_s1, 12288, %s129_s26, [#allocation5], %s1736_s9, %s1736_s9, %s1737_s10  }
  0x2c   : > { %p1106_p0 = scmp.ge.s32.totalorder %s1701_s15, 2 }
  0x2d   : > { %p2159_p2 = scmp.ne.s32.totalorder (!%p1106_p0), %s2154_s21, 0 }
  0x2e   : > { %141 = sbr.rel (%p1106_p0) target bundleno = 89 (0x59), region = 24 }
  0x35   : > { %144 = sbr.rel (!%p2159_p2) target bundleno = 89 (0x59), region = 28  ;;  %s145_s18 = sand.u32 (%p2159_p2), 1, %s1697_s14  }
  0x36   : > { %s150_s19 = smul.u32 (%p2159_p2), 13, %s1701_s15  ;;  %s1849_s30 = scalar_lea.sflag (%p2159_p2), [#allocation3], %s145_s18 }
  0x37   : > { %s1453_s25 = smul.u32 (%p2159_p2), 624, %s145_s18 }
  0x38   : > { %s151_s28 = ssub.s32 (%p2159_p2), 25, %s150_s19 }
  0x39   : > { %p152_p4 = scmp.lt.s32.totalorder (%p2159_p2), %s151_s28, 13  ;;  %s149_s26 = scalar_lea.vmem (%p2159_p2), [#allocation2], %s1453_s25 }
  0x3c   : > { %s2173_s28 = smov (!%p152_p4, %s151_s28), 13 }
  0x3d   : > { %s1846_s29 = smul.u32 768, %s2173_s28 }
  0x3f   : > { %s157_s27 = ssub.s32 9984, %s1846_s29 }
  0x40   : > { %158 = vsyncadd %s1849_s30, %s157_s27  ;;  %p1109_p5 = scmp.ne.s32.totalorder %s1846_s29, 0  ;;  %s1467_s21 = smul.u32 9984, %s1701_s15 }
  0x41   : > { %s164_s4 = sshll.u32 %s149_s26, 4  ;;  %s1607_s15 = scalar_lea.hbm %s2147_s0, 19200  ;;  %s1859_s4 = int_to_ptr.vmem [resolvable:$true] %s164_s4 }
  0x42   : > { %s1857_s7 = scalar_lea.hbm %s2147_s0, %s1467_s21 }
  0x43   : > { %s1603_s8 = scalar_lea.hbm %s1857_s7, %s1846_s29  ;;  %p1608_p13 = scmp.lt.u32.totalorder %s1857_s7, %s2147_s0 }
  0x44   : > { %p1604_p8 = scmp.ne.s32.totalorder %s1857_s7, %s1603_s8  ;;  %p1609_p1 = scmp.lt.u32.totalorder %s1607_s15, %s1603_s8 }
  0x45   : > { %p1611_p6 = scmp.lt.u32.totalorder %s1603_s8, %s1857_s7 }
  0x46   : > { %p1605_p10 = pnand %p1604_p8, %p1109_p5  ;;  %p1610_p3 = por %p1609_p1, %p1608_p13 }
  0x48   : > { %p1606_p11 = pneg %p1605_p10  ;;  %p1612_p7 = por %p1611_p6, %p1610_p3 }
  0x4a   : > { %p1613_p9 = pnand %p1612_p7, %p1606_p11 }
  0x4c   : > { %1616 = shalt.err (!%p1613_p9)
}
  0x4d   : > { %s1617_s18 = scalar_lea.vmem %s1859_s4, %s1846_s29  ;;  %s1738_s19 = smov [#allocation2]  }
  0x4e   : > { %p1618_p12 = scmp.ne.s32.totalorder %s1859_s4, %s1617_s18  ;;  %s1621_s25 = sshll.u32 %s1738_s19, 4  ;;  %s1622_s25 = int_to_ptr.vmem [resolvable:$false] %s1621_s25 }
  0x4f   : > { %s1623_s28 = scalar_lea.vmem %s1622_s25, 19968  ;;  %p1624_p4 = scmp.lt.s32.totalorder %s1859_s4, %s1622_s25 }
  0x50   : > { %p1619_p0 = pnand %p1618_p12, %p1109_p5  ;;  %p1625_p8 = scmp.lt.s32.totalorder %s1623_s28, %s1617_s18 }
  0x52   : > { %p1620_p2 = pneg %p1619_p0  ;;  %p1626_p10 = por %p1625_p8, %p1624_p4 }
  0x54   : > { %p1627_p13 = pnand %p1626_p10, %p1620_p2 }
  0x56   : > { %1630 = shalt.err (!%p1627_p13)
}
  0x57   : > { %s1739_s27 = smov 768   ;;  %s1740_s26 = smov 48  }
  0x58   : > { %170 = dma.hbm_to_vmem [thread:$0]  (%p1109_p5), %s1857_s7, %s1846_s29, %s1859_s4, %s1849_s30, %s1739_s27, %s1739_s27, %s1740_s26  }
  0x59 PF: > { %p2160_p11 = scmp.ne.s32.totalorder %s2157_s24, 0 }
  0x5a   : > { %s1889_s21 = sand.u32 (!%p2160_p11), 1, %s1693_s13   ;;  %p2161_p1 = scmp.ne.s32.totalorder (!%p2160_p11), %s2155_s22, 0 }
  0x5b   : > { %176 = sbr.rel (%p2160_p11) target bundleno = 495 (0x1ef), region = 32  ;;  %s179_s6 = scalar_lea.sflag (!%p2160_p11), [#allocation3], %s1889_s21 }
  0x5c   : > { %s1455_s5 = smul.u32 (!%p2160_p11), 624, %s1889_s21 }
  0x5e   : > { %s1893_s8 = scalar_lea.vmem (!%p2160_p11), [#allocation2], %s1455_s5 }
  0x62   : > { %1680 = dma.done.wait (%p2161_p1), %s179_s6, 9984  }
  0x63   : > { %1682 = vsyncadd (%p2161_p1), %s179_s6, 4294957312  ;;  %p2162_p5 = scmp.eq.s32.totalorder %s1780_s16, 0 }
  0x65   : > { %1684 = dma.done.wait (%p2162_p5), [#allocation5], 12288   ;;  %p2163_p3 = pmov %p2162_p5 }
  0x66   : > { %v313_v0 = vld [vmem:[#allocation4 + $0x80] sm:$0xff]  ;;  %v314_v1 = vld [vmem:[#allocation4 + $0x88] sm:$0xff]  ;;  %v315_v11 = vld [vmem:[#allocation4 + $0x90] sm:$0xff]  ;;  %s1456_s22 = smul.u32 104, %s1889_s21  ;;  %vm803_vm0 = vcmask 15360   ;;  %p2164_p6 = scmp.ne.s32.totalorder %s2156_s23, 0 }
  0x67   : > { %1686 = vsyncadd (%p2163_p3), [#allocation5], 4294955008  ;;  %v345_v2 = vld [vmem:[#allocation4 + $0x180] sm:$0xff]  ;;  %v1341_v3 = vpack.c.bf16 %v314_v1, %v313_v0  ;;  %v346_v4 = vld [vmem:[#allocation4 + $0x188] sm:$0xff]  ;;  %s824_s4 = smul.u32 (%p2164_p6), 13, %s1780_s16 }
  0x68   : > { %v297_v5 = vld [vmem:[#allocation4] sm:$0xff]  ;;  %v298_v6 = vld [vmem:[#allocation4 + $0x8] sm:$0xff]  ;;  %v1373_v7 = vpack.c.bf16 %v346_v4, %v345_v2  ;;  %v316_v13 = vld [vmem:[#allocation4 + $0x98] sm:$0xff]  ;;  %s2008_s30 = scalar_lea.vmem [#allocation6], %s1456_s22   ;;  %s1127_s7 = smul.u32 (%p2164_p6), 104, %s1780_s16 }
  0x69   : > { %v1343_v8 = vpack.c.bf16 %v298_v6, %v297_v5  ;;  %v329_v9 = vld [vmem:[#allocation4 + $0x100] sm:$0xff]  ;;  %v330_v10 = vld [vmem:[#allocation4 + $0x108] sm:$0xff]  ;;  %1342 = vmatprep.subr.bf16.mxu0 %v1341_v3  ;;  %v347_v14 = vld [vmem:[#allocation4 + $0x190] sm:$0xff]  ;;  %v1345_v16 = vpack.c.bf16 %v316_v13, %v315_v11  ;;  %s825_s9 = ssub.s32 (%p2164_p6), 25, %s824_s4 }
  0x6a   : > { %v1375_v12 = vpack.c.bf16 %v330_v10, %v329_v9  ;;  %v348_v15 = vld [vmem:[#allocation4 + $0x198] sm:$0xff]  ;;  %1374 = vmatprep.subr.bf16.mxu1 %v1373_v7  ;;  %v299_v18 = vld [vmem:[#allocation4 + $0x10] sm:$0xff]  ;;  %v317_v23 = vld [vmem:[#allocation4 + $0xa0] sm:$0xff]  ;;  %p826_p7 = scmp.lt.s32.totalorder (%p2164_p6), %s825_s9, 13  ;;  %s2062_s11 = scalar_lea.vmem (%p2164_p6), %s2150_s3, %s1127_s7  }
  0x6b   : > { %1344 = vmatpush3.bf16.msra.mxu0 %v1343_v8  ;;  %v1377_v17 = vpack.c.bf16 %v348_v15, %v347_v14  ;;  %v300_v19 = vld [vmem:[#allocation4 + $0x18] sm:$0xff]  ;;  %v331_v20 = vld [vmem:[#allocation4 + $0x110] sm:$0xff]  ;;  %v318_v24 = vld [vmem:[#allocation4 + $0xa8] sm:$0xff] }
  0x6c   : > { %1376 = vmatpush3.bf16.msra.mxu1 %v1375_v12  ;;  %v1347_v21 = vpack.c.bf16 %v300_v19, %v299_v18  ;;  %v332_v22 = vld [vmem:[#allocation4 + $0x118] sm:$0xff]  ;;  %1346 = vmatprep.subr.bf16.mxu0 %v1345_v16  ;;  %v1349_v26 = vpack.c.bf16 %v318_v24, %v317_v23  ;;  %v349_v27 = vld [vmem:[#allocation4 + $0x1a0] sm:$0xff]  ;;  %v350_v28 = vld [vmem:[#allocation4 + $0x1a8] sm:$0xff] }
  0x6d   : > { %1378 = vmatprep.subr.bf16.mxu1 %v1377_v17  ;;  %v1379_v25 = vpack.c.bf16 %v332_v22, %v331_v20  ;;  %v301_v29 = vld [vmem:[#allocation4 + $0x20] sm:$0xff]  ;;  %v1381_v30 = vpack.c.bf16 %v350_v28, %v349_v27  ;;  %v302_v31 = vld [vmem:[#allocation4 + $0x28] sm:$0xff]  ;;  %v319_v35 = vld [vmem:[#allocation4 + $0xb0] sm:$0xff] }
  0x6e   : > { %v333_v32 = vld [vmem:[#allocation4 + $0x120] sm:$0xff]  ;;  %v334_v33 = vld [vmem:[#allocation4 + $0x128] sm:$0xff]  ;;  %v1351_v34 = vpack.c.bf16 %v302_v31, %v301_v29  ;;  %v320_v36 = vld [vmem:[#allocation4 + $0xb8] sm:$0xff] }
  0x6f   : > { %1348 = vmatpush3.bf16.msra.mxu0 %v1347_v21  ;;  %v351_v37 = vld [vmem:[#allocation4 + $0x1b0] sm:$0xff]  ;;  %v1383_v38 = vpack.c.bf16 %v334_v33, %v333_v32  ;;  %v1353_v39 = vpack.c.bf16 %v320_v36, %v319_v35  ;;  %v352_v40 = vld [vmem:[#allocation4 + $0x1b8] sm:$0xff]  ;;  %v321_v46 = vld [vmem:[#allocation4 + $0xc0] sm:$0xff] }
  0x70   : > { %1380 = vmatpush3.bf16.msra.mxu1 %v1379_v25  ;;  %1350 = vmatprep.subr.bf16.mxu0 %v1349_v26  ;;  %v303_v41 = vld [vmem:[#allocation4 + $0x30] sm:$0xff]  ;;  %v304_v42 = vld [vmem:[#allocation4 + $0x38] sm:$0xff]  ;;  %v1385_v43 = vpack.c.bf16 %v352_v40, %v351_v37  ;;  %v322_v47 = vld [vmem:[#allocation4 + $0xc8] sm:$0xff] }
  0x71   : > { %1382 = vmatprep.subr.bf16.mxu1 %v1381_v30  ;;  %v335_v44 = vld [vmem:[#allocation4 + $0x130] sm:$0xff]  ;;  %v336_v45 = vld [vmem:[#allocation4 + $0x138] sm:$0xff]  ;;  %v353_v48 = vld [vmem:[#allocation4 + $0x1c0] sm:$0xff]  ;;  %v1355_v50 = vpack.c.bf16 %v304_v42, %v303_v41  ;;  %v1357_v52 = vpack.c.bf16 %v322_v47, %v321_v46 }
  0x72   : > { %v354_v49 = vld [vmem:[#allocation4 + $0x1c8] sm:$0xff]  ;;  %v1387_v51 = vpack.c.bf16 %v336_v45, %v335_v44  ;;  %v305_v53 = vld [vmem:[#allocation4 + $0x40] sm:$0xff]  ;;  %v323_v58 = vld [vmem:[#allocation4 + $0xd0] sm:$0xff] }
  0x73   : > { %1352 = vmatpush3.bf16.msra.mxu0 %v1351_v34  ;;  %v306_v54 = vld [vmem:[#allocation4 + $0x48] sm:$0xff]  ;;  %v337_v55 = vld [vmem:[#allocation4 + $0x140] sm:$0xff]  ;;  %v1389_v56 = vpack.c.bf16 %v354_v49, %v353_v48  ;;  %v324_v59 = vld [vmem:[#allocation4 + $0xd8] sm:$0xff] }
  0x74   : > { %1384 = vmatpush3.bf16.msra.mxu1 %v1383_v38  ;;  %1354 = vmatprep.subr.bf16.mxu0 %v1353_v39  ;;  %v338_v57 = vld [vmem:[#allocation4 + $0x148] sm:$0xff]  ;;  %v355_v60 = vld [vmem:[#allocation4 + $0x1d0] sm:$0xff]  ;;  %v356_v61 = vld [vmem:[#allocation4 + $0x1d8] sm:$0xff]  ;;  %v1359_v62 = vpack.c.bf16 %v306_v54, %v305_v53  ;;  %v1361_v0 = vpack.c.bf16 %v324_v59, %v323_v58 }
  0x75   : > { %1386 = vmatprep.subr.bf16.mxu1 %v1385_v43  ;;  %v1391_v63 = vpack.c.bf16 %v338_v57, %v337_v55  ;;  %v307_v1 = vld [vmem:[#allocation4 + $0x50] sm:$0xff]  ;;  %v308_v2 = vld [vmem:[#allocation4 + $0x58] sm:$0xff]  ;;  %v1393_v4 = vpack.c.bf16 %v356_v61, %v355_v60  ;;  %v325_v6 = vld [vmem:[#allocation4 + $0xe0] sm:$0xff] }
  0x76   : > { %v339_v3 = vld [vmem:[#allocation4 + $0x150] sm:$0xff]  ;;  %v340_v5 = vld [vmem:[#allocation4 + $0x158] sm:$0xff]  ;;  %v326_v7 = vld [vmem:[#allocation4 + $0xe8] sm:$0xff]  ;;  %v1363_v10 = vpack.c.bf16 %v308_v2, %v307_v1 }
  0x77   : > { %1356 = vmatpush3.bf16.msra.mxu0 %v1355_v50  ;;  %v357_v8 = vld [vmem:[#allocation4 + $0x1e0] sm:$0xff]  ;;  %v358_v9 = vld [vmem:[#allocation4 + $0x1e8] sm:$0xff]  ;;  %v1395_v13 = vpack.c.bf16 %v340_v5, %v339_v3  ;;  %v1365_v14 = vpack.c.bf16 %v326_v7, %v325_v6  ;;  %v327_v20 = vld [vmem:[#allocation4 + $0xf0] sm:$0xff] }
  0x78   : > { %1388 = vmatpush3.bf16.msra.mxu1 %v1387_v51  ;;  %1358 = vmatprep.subr.bf16.mxu0 %v1357_v52  ;;  %v309_v11 = vld [vmem:[#allocation4 + $0x60] sm:$0xff]  ;;  %v310_v12 = vld [vmem:[#allocation4 + $0x68] sm:$0xff]  ;;  %v1397_v18 = vpack.c.bf16 %v358_v9, %v357_v8  ;;  %v328_v21 = vld [vmem:[#allocation4 + $0xf8] sm:$0xff] }
  0x79   : > { %1390 = vmatprep.subr.bf16.mxu1 %v1389_v56  ;;  %v341_v15 = vld [vmem:[#allocation4 + $0x160] sm:$0xff]  ;;  %v220_v16 = vld [vmem:[%s1893_s8 + $0x8] sm:$0xff]  ;;  %v222_v17 = vld [vmem:[%s1893_s8 + $0x18] sm:$0xff]  ;;  %v1367_v24 = vpack.c.bf16 %v310_v12, %v309_v11  ;;  %v1369_v26 = vpack.c.bf16 %v328_v21, %v327_v20 }
  0x7a   : > { %v342_v19 = vld [vmem:[#allocation4 + $0x168] sm:$0xff]  ;;  %457 = vmatprep.mubr.f32.mxu0 %v220_v16  ;;  %v359_v22 = vld [vmem:[#allocation4 + $0x1f0] sm:$0xff]  ;;  %v360_v23 = vld [vmem:[#allocation4 + $0x1f8] sm:$0xff]  ;;  %587 = vmatprep.mubr.f32.mxu1 %v222_v17 }
  0x7b   : > { %1360 = vmatpush3.bf16.msra.mxu0 %v1359_v62  ;;  %v1399_v25 = vpack.c.bf16 %v342_v19, %v341_v15  ;;  %v311_v27 = vld [vmem:[#allocation4 + $0x70] sm:$0xff]  ;;  %v312_v28 = vld [vmem:[#allocation4 + $0x78] sm:$0xff]  ;;  %v1401_v30 = vpack.c.bf16 %v360_v23, %v359_v22  ;;  %v377_v32 = vld [vmem:[#allocation4 + $0x280] sm:$0xff] }
  0x7c   : > { %1392 = vmatpush3.bf16.msra.mxu1 %v1391_v63  ;;  %1362 = vmatprep.subr.bf16.mxu0 %v1361_v0  ;;  %v343_v29 = vld [vmem:[#allocation4 + $0x170] sm:$0xff]  ;;  %v344_v31 = vld [vmem:[#allocation4 + $0x178] sm:$0xff]  ;;  %v378_v33 = vld [vmem:[#allocation4 + $0x288] sm:$0xff]  ;;  %v1371_v34 = vpack.c.bf16 %v312_v28, %v311_v27 }
  0x7d   : > { %1394 = vmatprep.subr.bf16.mxu1 %v1393_v4  ;;  %v1403_v35 = vpack.c.bf16 %v344_v31, %v343_v29  ;;  %v1405_v36 = vpack.c.bf16 %v378_v33, %v377_v32  ;;  %v361_v37 = vld [vmem:[#allocation4 + $0x200] sm:$0xff]  ;;  %v362_v38 = vld [vmem:[#allocation4 + $0x208] sm:$0xff]  ;;  %v379_v39 = vld [vmem:[#allocation4 + $0x290] sm:$0xff] }
  0x7e   : > { %v380_v40 = vld [vmem:[#allocation4 + $0x298] sm:$0xff]  ;;  %v219_v41 = vld [vmem:[%s1893_s8] sm:$0xff]  ;;  %v1407_v42 = vpack.c.bf16 %v362_v38, %v361_v37  ;;  %v221_v43 = vld [vmem:[%s1893_s8 + $0x10] sm:$0xff] }
  0x7f   : > { %1364 = vmatpush3.bf16.msra.mxu0 %v1363_v10  ;;  %v226_v44 = vld [vmem:[%s1893_s8 + $0x38] sm:$0xff]  ;;  %v228_v45 = vld [vmem:[%s1893_s8 + $0x48] sm:$0xff]  ;;  %v1409_v46 = vpack.c.bf16 %v380_v40, %v379_v39  ;;  %v363_v47 = vld [vmem:[#allocation4 + $0x210] sm:$0xff] }
  0x80   : > { %1396 = vmatpush3.bf16.msra.mxu1 %v1395_v13  ;;  %1366 = vmatprep.subr.bf16.mxu0 %v1365_v14  ;;  %v364_v48 = vld [vmem:[#allocation4 + $0x218] sm:$0xff]  ;;  %v381_v49 = vld [vmem:[#allocation4 + $0x2a0] sm:$0xff]  ;;  %v382_v50 = vld [vmem:[#allocation4 + $0x2a8] sm:$0xff] }
  0x81   : > { %1398 = vmatprep.subr.bf16.mxu1 %v1397_v18  ;;  %v225_v51 = vld [vmem:[%s1893_s8 + $0x30] sm:$0xff]  ;;  %v227_v52 = vld [vmem:[%s1893_s8 + $0x40] sm:$0xff]  ;;  %v232_v53 = vld [vmem:[%s1893_s8 + $0x68] sm:$0xff]  ;;  %v1411_v54 = vpack.c.bf16 %v364_v48, %v363_v47  ;;  %v1413_v56 = vpack.c.bf16 %v382_v50, %v381_v49 }
  0x82   : > { %v234_v55 = vld [vmem:[%s1893_s8 + $0x78] sm:$0xff]  ;;  %v365_v57 = vld [vmem:[#allocation4 + $0x220] sm:$0xff]  ;;  %v383_v59 = vld [vmem:[#allocation4 + $0x2b0] sm:$0xff] }
  0x83   : > { %1368 = vmatpush3.bf16.msra.mxu0 %v1367_v24  ;;  %v366_v58 = vld [vmem:[#allocation4 + $0x228] sm:$0xff]  ;;  %v384_v60 = vld [vmem:[#allocation4 + $0x2b8] sm:$0xff]  ;;  %v231_v61 = vld [vmem:[%s1893_s8 + $0x60] sm:$0xff] }
  0x84   : > { %1400 = vmatpush3.bf16.msra.mxu1 %v1399_v25  ;;  %1370 = vmatprep.subr.bf16.mxu0 %v1369_v26  ;;  %v233_v62 = vld [vmem:[%s1893_s8 + $0x70] sm:$0xff]  ;;  %v238_v63 = vld [vmem:[%s1893_s8 + $0x98] sm:$0xff]  ;;  %v1415_v0 = vpack.c.bf16 %v366_v58, %v365_v57  ;;  %v240_v1 = vld [vmem:[%s1893_s8 + $0xa8] sm:$0xff]  ;;  %v1417_v2 = vpack.c.bf16 %v384_v60, %v383_v59 }
  0x85   : > { %1402 = vmatprep.subr.bf16.mxu1 %v1401_v30  ;;  %v367_v3 = vld [vmem:[#allocation4 + $0x230] sm:$0xff]  ;;  %v368_v4 = vld [vmem:[#allocation4 + $0x238] sm:$0xff]  ;;  %v385_v5 = vld [vmem:[#allocation4 + $0x2c0] sm:$0xff] }
  0x86   : > { %v386_v6 = vld [vmem:[#allocation4 + $0x2c8] sm:$0xff]  ;;  %v237_v7 = vld [vmem:[%s1893_s8 + $0x90] sm:$0xff]  ;;  %v239_v8 = vld [vmem:[%s1893_s8 + $0xa0] sm:$0xff]  ;;  %v1419_v10 = vpack.c.bf16 %v368_v4, %v367_v3 }
  0x87   : > { %1372 = vmatpush3.bf16.msra.mxu0 %v1371_v34  ;;  %v244_v9 = vld [vmem:[%s1893_s8 + $0xc8] sm:$0xff]  ;;  %v246_v11 = vld [vmem:[%s1893_s8 + $0xd8] sm:$0xff]  ;;  %v1421_v12 = vpack.c.bf16 %v386_v6, %v385_v5  ;;  %v369_v13 = vld [vmem:[#allocation4 + $0x240] sm:$0xff] }
  0x88   : > { %1404 = vmatpush3.bf16.msra.mxu1 %v1403_v35  ;;  %1406 = vmatprep.subr.bf16.mxu0 %v1405_v36  ;;  %v370_v14 = vld [vmem:[#allocation4 + $0x248] sm:$0xff]  ;;  %v387_v15 = vld [vmem:[#allocation4 + $0x2d0] sm:$0xff]  ;;  %v388_v16 = vld [vmem:[#allocation4 + $0x2d8] sm:$0xff] }
  0x89   : > { %1437 = vmatprep.subr.bf16.mxu1 %v1405_v36  ;;  %v243_v17 = vld [vmem:[%s1893_s8 + $0xc0] sm:$0xff]  ;;  %v245_v18 = vld [vmem:[%s1893_s8 + $0xd0] sm:$0xff]  ;;  %v250_v19 = vld [vmem:[%s1893_s8 + $0xf8] sm:$0xff]  ;;  %v1423_v20 = vpack.c.bf16 %v370_v14, %v369_v13  ;;  %v1425_v22 = vpack.c.bf16 %v388_v16, %v387_v15 }
  0x8a   : > { %458 = vmatmul.mubr.f32.vlgmr.msra.gmra.mrb[0].mxu0 %v219_v41  ;;  %v252_v21 = vld [vmem:[%s1893_s8 + $0x108] sm:$0xff]  ;;  %v371_v23 = vld [vmem:[#allocation4 + $0x250] sm:$0xff]  ;;  %v389_v25 = vld [vmem:[#allocation4 + $0x2e0] sm:$0xff] }
  0x8b   : > { %588 = vmatmul.mubr.f32.vlgmr.msra.gmra.mrb[0].mxu1 %v221_v43  ;;  %1408 = vmatpush3.bf16.msra.mxu0 %v1407_v42  ;;  %v372_v24 = vld [vmem:[#allocation4 + $0x258] sm:$0xff]  ;;  %v390_v26 = vld [vmem:[#allocation4 + $0x2e8] sm:$0xff]  ;;  %v249_v27 = vld [vmem:[%s1893_s8 + $0xf0] sm:$0xff] }
  0x8c   : > { %462 = vmatprep.mubr.f32.mxu0 %v226_v44  ;;  %592 = vmatprep.mubr.f32.mxu1 %v228_v45  ;;  %v251_v28 = vld [vmem:[%s1893_s8 + $0x100] sm:$0xff]  ;;  %v256_v29 = vld [vmem:[%s1893_s8 + $0x128] sm:$0xff]  ;;  %v1427_v30 = vpack.c.bf16 %v372_v24, %v371_v23  ;;  %v258_v31 = vld [vmem:[%s1893_s8 + $0x138] sm:$0xff]  ;;  %v1429_v32 = vpack.c.bf16 %v390_v26, %v389_v25 }
  0x8d   : > { %1445 = vmatpush3.bf16.msra.mxu1 %v1407_v42  ;;  %1410 = vmatprep.subr.bf16.mxu0 %v1409_v46  ;;  %v373_v33 = vld [vmem:[#allocation4 + $0x260] sm:$0xff]  ;;  %v374_v34 = vld [vmem:[#allocation4 + $0x268] sm:$0xff]  ;;  %v391_v35 = vld [vmem:[#allocation4 + $0x2f0] sm:$0xff] }
  0x8e   : > { %463 = vmatmul.mubr.f32.gmra.mrb[2].mxu0 %v225_v51  ;;  %1438 = vmatprep.subr.bf16.mxu1 %v1409_v46  ;;  %v392_v36 = vld [vmem:[#allocation4 + $0x2f8] sm:$0xff]  ;;  %v255_v37 = vld [vmem:[%s1893_s8 + $0x120] sm:$0xff]  ;;  %v257_v38 = vld [vmem:[%s1893_s8 + $0x130] sm:$0xff]  ;;  %v1431_v40 = vpack.c.bf16 %v374_v34, %v373_v33 }
  0x8f   : > { %593 = vmatmul.mubr.f32.gmra.mrb[2].mxu1 %v227_v52  ;;  %467 = vmatprep.mubr.f32.mxu0 %v232_v53  ;;  %v262_v39 = vld [vmem:[%s1893_s8 + $0x158] sm:$0xff]  ;;  %v264_v41 = vld [vmem:[%s1893_s8 + $0x168] sm:$0xff]  ;;  %v1433_v42 = vpack.c.bf16 %v392_v36, %v391_v35  ;;  %v375_v43 = vld [vmem:[#allocation4 + $0x270] sm:$0xff] }
  0x90   : > { %597 = vmatprep.mubr.f32.mxu1 %v234_v55  ;;  %1412 = vmatpush3.bf16.msra.mxu0 %v1411_v54  ;;  %v376_v44 = vld [vmem:[#allocation4 + $0x278] sm:$0xff]  ;;  %v261_v45 = vld [vmem:[%s1893_s8 + $0x150] sm:$0xff]  ;;  %v263_v46 = vld [vmem:[%s1893_s8 + $0x160] sm:$0xff] }
  0x91   : > { %1446 = vmatpush3.bf16.msra.mxu1 %v1411_v54  ;;  %1414 = vmatprep.subr.bf16.mxu0 %v1413_v56  ;;  %v268_v47 = vld [vmem:[%s1893_s8 + $0x188] sm:$0xff]  ;;  %v1435_v48 = vpack.c.bf16 %v376_v44, %v375_v43  ;;  %v270_v49 = vld [vmem:[%s1893_s8 + $0x198] sm:$0xff]  ;;  %v267_v50 = vld [vmem:[%s1893_s8 + $0x180] sm:$0xff] }
  0x92   : > { %468 = vmatmul.mubr.f32.gmra.mrb[4].mxu0 %v231_v61  ;;  %1439 = vmatprep.subr.bf16.mxu1 %v1413_v56  ;;  %v269_v51 = vld [vmem:[%s1893_s8 + $0x190] sm:$0xff]  ;;  %v274_v52 = vld [vmem:[%s1893_s8 + $0x1b8] sm:$0xff]  ;;  %v276_v53 = vld [vmem:[%s1893_s8 + $0x1c8] sm:$0xff] }
  0x93   : > { %598 = vmatmul.mubr.f32.gmra.mrb[4].mxu1 %v233_v62  ;;  %472 = vmatprep.mubr.f32.mxu0 %v238_v63  ;;  %v273_v54 = vld [vmem:[%s1893_s8 + $0x1b0] sm:$0xff]  ;;  %v275_v55 = vld [vmem:[%s1893_s8 + $0x1c0] sm:$0xff]  ;;  %v280_v56 = vld [vmem:[%s1893_s8 + $0x1e8] sm:$0xff] }
  0x94   : > { %602 = vmatprep.mubr.f32.mxu1 %v240_v1  ;;  %1416 = vmatpush3.bf16.msra.mxu0 %v1415_v0  ;;  %v282_v57 = vld [vmem:[%s1893_s8 + $0x1f8] sm:$0xff]  ;;  %v279_v58 = vld [vmem:[%s1893_s8 + $0x1e0] sm:$0xff]  ;;  %v281_v59 = vld [vmem:[%s1893_s8 + $0x1f0] sm:$0xff] }
  0x95   : > { %1447 = vmatpush3.bf16.msra.mxu1 %v1415_v0  ;;  %1418 = vmatprep.subr.bf16.mxu0 %v1417_v2  ;;  %v286_v60 = vld [vmem:[%s1893_s8 + $0x218] sm:$0xff]  ;;  %v288_v61 = vld [vmem:[%s1893_s8 + $0x228] sm:$0xff]  ;;  %v285_v62 = vld [vmem:[%s1893_s8 + $0x210] sm:$0xff] }
  0x96   : > { %473 = vmatmul.mubr.f32.gmra.mrb[6].mxu0 %v237_v7  ;;  %1440 = vmatprep.subr.bf16.mxu1 %v1417_v2  ;;  %v287_v63 = vld [vmem:[%s1893_s8 + $0x220] sm:$0xff]  ;;  %v292_v0 = vld [vmem:[%s1893_s8 + $0x248] sm:$0xff]  ;;  %v294_v1 = vld [vmem:[%s1893_s8 + $0x258] sm:$0xff] }
  0x97   : > { %603 = vmatmul.mubr.f32.gmra.mrb[6].mxu1 %v239_v8  ;;  %477 = vmatprep.mubr.f32.mxu0 %v244_v9  ;;  %v291_v2 = vld [vmem:[%s1893_s8 + $0x240] sm:$0xff]  ;;  %v293_v3 = vld [vmem:[%s1893_s8 + $0x250] sm:$0xff]  ;;  %v224_v4 = vld [vmem:[%s1893_s8 + $0x28] sm:$0xff] }
  0x98   : > { %607 = vmatprep.mubr.f32.mxu1 %v246_v11  ;;  %1420 = vmatpush3.bf16.msra.mxu0 %v1419_v10  ;;  %v266_v5 = vld [vmem:[%s1893_s8 + $0x178] sm:$0xff]  ;;  %v223_v6 = vld [vmem:[%s1893_s8 + $0x20] sm:$0xff]  ;;  %v265_v7 = vld [vmem:[%s1893_s8 + $0x170] sm:$0xff] }
  0x99   : > { %1448 = vmatpush3.bf16.msra.mxu1 %v1419_v10  ;;  %1422 = vmatprep.subr.bf16.mxu0 %v1421_v12  ;;  %v230_v8 = vld [vmem:[%s1893_s8 + $0x58] sm:$0xff]  ;;  %v272_v9 = vld [vmem:[%s1893_s8 + $0x1a8] sm:$0xff]  ;;  %v229_v10 = vld [vmem:[%s1893_s8 + $0x50] sm:$0xff] }
  0x9a   : > { %478 = vmatmul.mubr.f32.gmra.mrb[8].mxu0 %v243_v17  ;;  %1441 = vmatprep.subr.bf16.mxu1 %v1421_v12  ;;  %v271_v11 = vld [vmem:[%s1893_s8 + $0x1a0] sm:$0xff]  ;;  %v236_v12 = vld [vmem:[%s1893_s8 + $0x88] sm:$0xff]  ;;  %v278_v13 = vld [vmem:[%s1893_s8 + $0x1d8] sm:$0xff] }
  0x9b   : > { %608 = vmatmul.mubr.f32.gmra.mrb[8].mxu1 %v245_v18  ;;  %482 = vmatprep.mubr.f32.mxu0 %v250_v19  ;;  %v235_v14 = vld [vmem:[%s1893_s8 + $0x80] sm:$0xff]  ;;  %v277_v15 = vld [vmem:[%s1893_s8 + $0x1d0] sm:$0xff]  ;;  %v242_v16 = vld [vmem:[%s1893_s8 + $0xb8] sm:$0xff] }
  0x9c   : > { %612 = vmatprep.mubr.f32.mxu1 %v252_v21  ;;  %1424 = vmatpush3.bf16.msra.mxu0 %v1423_v20  ;;  %v284_v17 = vld [vmem:[%s1893_s8 + $0x208] sm:$0xff]  ;;  %v241_v18 = vld [vmem:[%s1893_s8 + $0xb0] sm:$0xff]  ;;  %v283_v19 = vld [vmem:[%s1893_s8 + $0x200] sm:$0xff] }
  0x9d   : > { %1449 = vmatpush3.bf16.msra.mxu1 %v1423_v20  ;;  %1426 = vmatprep.subr.bf16.mxu0 %v1425_v22  ;;  %v248_v20 = vld [vmem:[%s1893_s8 + $0xe8] sm:$0xff]  ;;  %v290_v21 = vld [vmem:[%s1893_s8 + $0x238] sm:$0xff]  ;;  %v289_v23 = vld [vmem:[%s1893_s8 + $0x230] sm:$0xff] }
  0x9e   : > { %483 = vmatmul.mubr.f32.gmra.mrb[10].mxu0 %v249_v27  ;;  %1442 = vmatprep.subr.bf16.mxu1 %v1425_v22  ;;  %v247_v22 = vld [vmem:[%s1893_s8 + $0xe0] sm:$0xff]  ;;  %v254_v24 = vld [vmem:[%s1893_s8 + $0x118] sm:$0xff]  ;;  %v296_v25 = vld [vmem:[%s1893_s8 + $0x268] sm:$0xff] }
  0x9f   : > { %613 = vmatmul.mubr.f32.gmra.mrb[10].mxu1 %v251_v28  ;;  %487 = vmatprep.mubr.f32.mxu0 %v256_v29  ;;  %v253_v26 = vld [vmem:[%s1893_s8 + $0x110] sm:$0xff]  ;;  %v295_v27 = vld [vmem:[%s1893_s8 + $0x260] sm:$0xff]  ;;  %v260_v28 = vld [vmem:[%s1893_s8 + $0x148] sm:$0xff] }
  0xa0   : > { %617 = vmatprep.mubr.f32.mxu1 %v258_v31  ;;  %1428 = vmatpush3.bf16.msra.mxu0 %v1427_v30  ;;  %v259_v29 = vld [vmem:[%s1893_s8 + $0x140] sm:$0xff] }
  0xa1   : > { %1450 = vmatpush3.bf16.msra.mxu1 %v1427_v30  ;;  %1430 = vmatprep.subr.bf16.mxu0 %v1429_v32 }
  0xa2   : > { %488 = vmatmul.mubr.f32.gmra.mrb[12].mxu0 %v255_v37  ;;  %1443 = vmatprep.subr.bf16.mxu1 %v1429_v32 }
  0xa3   : > { %618 = vmatmul.mubr.f32.gmra.mrb[12].mxu1 %v257_v38  ;;  %492 = vmatprep.mubr.f32.mxu0 %v262_v39 }
  0xa4   : > { %622 = vmatprep.mubr.f32.mxu1 %v264_v41  ;;  %1432 = vmatpush3.bf16.msra.mxu0 %v1431_v40 }
  0xa5   : > { %1451 = vmatpush3.bf16.msra.mxu1 %v1431_v40  ;;  %1434 = vmatprep.subr.bf16.mxu0 %v1433_v42 }
  0xa6   : > { %493 = vmatmul.mubr.f32.gmra.mrb[14].mxu0 %v261_v45  ;;  %1444 = vmatprep.subr.bf16.mxu1 %v1433_v42 }
  0xa7   : > { %623 = vmatmul.mubr.f32.gmra.mrb[14].mxu1 %v263_v46  ;;  %497 = vmatprep.mubr.f32.mxu0 %v268_v47 }
  0xa8   : > { %627 = vmatprep.mubr.f32.mxu1 %v270_v49  ;;  %1436 = vmatpush3.bf16.msra.mxu0 %v1435_v48 }
  0xa9   : > { %1452 = vmatpush3.bf16.msra.mxu1 %v1435_v48 }
  0xaa   : > { %498 = vmatmul.mubr.f32.gmra.mrb[16].mxu0 %v267_v50 }
  0xab   : > { %628 = vmatmul.mubr.f32.gmra.mrb[16].mxu1 %v269_v51  ;;  %502 = vmatprep.mubr.f32.mxu0 %v274_v52 }
  0xac   : > { %632 = vmatprep.mubr.f32.mxu1 %v276_v53 }
  0xae   : > { %503 = vmatmul.mubr.f32.gmra.mrb[18].mxu0 %v273_v54 }
  0xaf   : > { %633 = vmatmul.mubr.f32.gmra.mrb[18].mxu1 %v275_v55  ;;  %507 = vmatprep.mubr.f32.mxu0 %v280_v56 }
  0xb0   : > { %637 = vmatprep.mubr.f32.mxu1 %v282_v57 }
  0xb2   : > { %508 = vmatmul.mubr.f32.gmra.mrb[20].mxu0 %v279_v58 }
  0xb3   : > { %638 = vmatmul.mubr.f32.gmra.mrb[20].mxu1 %v281_v59  ;;  %512 = vmatprep.mubr.f32.mxu0 %v286_v60 }
  0xb4   : > { %642 = vmatprep.mubr.f32.mxu1 %v288_v61 }
  0xb6   : > { %513 = vmatmul.mubr.f32.gmra.mrb[22].mxu0 %v285_v62 }
  0xb7   : > { %643 = vmatmul.mubr.f32.gmra.mrb[22].mxu1 %v287_v63  ;;  %517 = vmatprep.mubr.f32.mxu0 %v292_v0 }
  0xb8   : > { %647 = vmatprep.mubr.f32.mxu1 %v294_v1 }
  0xba   : > { %518 = vmatmul.mubr.f32.gmra.mrb[24].mxu0 %v291_v2 }
  0xbb   : > { %648 = vmatmul.mubr.f32.gmra.mrb[24].mxu1 %v293_v3  ;;  %717 = vmatprep.mubr.f32.mxu0 %v224_v4 }
  0xbc   : > { %752 = vmatprep.mubr.f32.mxu1 %v266_v5 }
  0xbe   : > { %718 = vmatmul.mubr.f32.vlgmr.msra.gmra.mrb[26].mxu0 %v223_v6 }
  0xbf   : > { %753 = vmatmul.mubr.f32.vlgmr.msra.gmra.mrb[26].mxu1 %v265_v7  ;;  %722 = vmatprep.mubr.f32.mxu0 %v230_v8 }
  0xc0   : > { %757 = vmatprep.mubr.f32.mxu1 %v272_v9 }
  0xc2   : > { %723 = vmatmul.mubr.f32.gmra.mrb[28].mxu0 %v229_v10 }
  0xc3   : > { %758 = vmatmul.mubr.f32.gmra.mrb[28].mxu1 %v271_v11  ;;  %727 = vmatprep.mubr.f32.mxu0 %v236_v12 }
  0xc4   : > { %762 = vmatprep.mubr.f32.mxu1 %v278_v13 }
  0xc6   : > { %728 = vmatmul.mubr.f32.gmra.mrb[30].mxu0 %v235_v14 }
  0xc7   : > { %763 = vmatmul.mubr.f32.gmra.mrb[30].mxu1 %v277_v15  ;;  %732 = vmatprep.mubr.f32.mxu0 %v242_v16 }
  0xc8   : > { %767 = vmatprep.mubr.f32.mxu1 %v284_v17 }
  0xca   : > { %733 = vmatmul.mubr.f32.gmra.mrb[32].mxu0 %v241_v18 }
  0xcb   : > { %768 = vmatmul.mubr.f32.gmra.mrb[32].mxu1 %v283_v19  ;;  %737 = vmatprep.mubr.f32.mxu0 %v248_v20 }
  0xcc   : > { %772 = vmatprep.mubr.f32.mxu1 %v290_v21 }
  0xce   : > { %738 = vmatmul.mubr.f32.gmra.mrb[34].mxu0 %v247_v22 }
  0xcf   : > { %773 = vmatmul.mubr.f32.gmra.mrb[34].mxu1 %v289_v23  ;;  %742 = vmatprep.mubr.f32.mxu0 %v254_v24 }
  0xd0   : > { %777 = vmatprep.mubr.f32.mxu1 %v296_v25 }
  0xd2   : > { %743 = vmatmul.mubr.f32.gmra.mrb[36].mxu0 %v253_v26 }
  0xd3   : > { %778 = vmatmul.mubr.f32.gmra.mrb[36].mxu1 %v295_v27  ;;  %747 = vmatprep.mubr.f32.mxu0 %v260_v28 }
  0xd6   : > { %748 = vmatmul.mubr.f32.gmra.mrb[38].mxu0 %v259_v29 }
 0x15d   : > { %v1160_v30 = vpop.f32.mrb[0].mxu0 }
 0x15e   : > { %v1231_v31 = vpop.f32.mrb[0].mxu1  ;;  %v1161_v32 = vpop.f32.mrb[1].mxu0 }
 0x15f   : > { %v1162_v33 = vadd.f32 %v1161_v32, %v1160_v30  ;;  %v1232_v34 = vpop.f32.mrb[1].mxu1 }
 0x160   : > { %v1233_v35 = vadd.f32 %v1232_v34, %v1231_v31 }
 0x161   : > { %v1163_v36 = vpop.f32.mrb[2].mxu0 }
 0x162   : > { %v1981_v37 = vadd.f32 %v1233_v35, %v1162_v33  ;;  %v1234_v38 = vpop.f32.mrb[2].mxu1  ;;  %v1164_v39 = vpop.f32.mrb[3].mxu0 }
 0x163   : > { %v1165_v40 = vadd.f32 %v1164_v39, %v1163_v36  ;;  %v1235_v41 = vpop.f32.mrb[3].mxu1 }
 0x164   : > { %v1236_v42 = vadd.f32 %v1235_v41, %v1234_v38 }
 0x165   : > { %v1166_v43 = vpop.f32.mrb[4].mxu0 }
 0x166   : > { %v1983_v44 = vadd.f32 %v1236_v42, %v1165_v40  ;;  %v1237_v45 = vpop.f32.mrb[4].mxu1  ;;  %v1167_v46 = vpop.f32.mrb[5].mxu0 }
 0x167   : > { %v1168_v47 = vadd.f32 %v1167_v46, %v1166_v43  ;;  %v1238_v48 = vpop.f32.mrb[5].mxu1 }
 0x168   : > { %v1239_v49 = vadd.f32 %v1238_v48, %v1237_v45 }
 0x169   : > { %v1169_v50 = vpop.f32.mrb[6].mxu0 }
 0x16a   : > { %v1985_v51 = vadd.f32 %v1239_v49, %v1168_v47  ;;  %v1240_v52 = vpop.f32.mrb[6].mxu1  ;;  %v1170_v53 = vpop.f32.mrb[7].mxu0 }
 0x16b   : > { %v1171_v54 = vadd.f32 %v1170_v53, %v1169_v50  ;;  %v1241_v55 = vpop.f32.mrb[7].mxu1 }
 0x16c   : > { %v1242_v56 = vadd.f32 %v1241_v55, %v1240_v52 }
 0x16d   : > { %v1172_v57 = vpop.f32.mrb[8].mxu0 }
 0x16e   : > { %v1987_v58 = vadd.f32 %v1242_v56, %v1171_v54  ;;  %v1243_v59 = vpop.f32.mrb[8].mxu1  ;;  %v1173_v60 = vpop.f32.mrb[9].mxu0 }
 0x16f   : > { %v1174_v61 = vadd.f32 %v1173_v60, %v1172_v57  ;;  %v1244_v62 = vpop.f32.mrb[9].mxu1 }
 0x170   : > { %v1245_v63 = vadd.f32 %v1244_v62, %v1243_v59 }
 0x171   : > { %v1175_v0 = vpop.f32.mrb[10].mxu0 }
 0x172   : > { %v1989_v1 = vadd.f32 %v1245_v63, %v1174_v61  ;;  %v1246_v2 = vpop.f32.mrb[10].mxu1  ;;  %v1176_v3 = vpop.f32.mrb[11].mxu0 }
 0x173   : > { %v1177_v4 = vadd.f32 %v1176_v3, %v1175_v0  ;;  %v1247_v5 = vpop.f32.mrb[11].mxu1  ;;  %v2003_v3 = vld [vmem:[%s2149_s2] ss:$0 sm:$0xff] }
 0x174   : > { %v1248_v6 = vadd.f32 %v1247_v5, %v1246_v2 }
 0x175   : > { %v1178_v7 = vpop.f32.mrb[12].mxu0 }
 0x176   : > { %v1991_v8 = vadd.f32 %v1248_v6, %v1177_v4  ;;  %v1249_v9 = vpop.f32.mrb[12].mxu1  ;;  %v1179_v10 = vpop.f32.mrb[13].mxu0 }
 0x177   : > { %v1180_v11 = vadd.f32 %v1179_v10, %v1178_v7  ;;  %v1250_v12 = vpop.f32.mrb[13].mxu1 }
 0x178   : > { %v1251_v13 = vadd.f32 %v1250_v12, %v1249_v9 }
 0x179   : > { %v1181_v14 = vpop.f32.mrb[14].mxu0 }
 0x17a   : > { %v1993_v15 = vadd.f32 %v1251_v13, %v1180_v11  ;;  %v1252_v16 = vpop.f32.mrb[14].mxu1  ;;  %v1182_v17 = vpop.f32.mrb[15].mxu0 }
 0x17b   : > { %v1183_v18 = vadd.f32 %v1182_v17, %v1181_v14  ;;  %v1253_v19 = vpop.f32.mrb[15].mxu1 }
 0x17c   : > { %v1254_v20 = vadd.f32 %v1253_v19, %v1252_v16 }
 0x17d   : > { %v1184_v21 = vpop.f32.mrb[16].mxu0 }
 0x17e   : > { %v625_v22 = vadd.f32 %v1254_v20, %v1183_v18  ;;  %v1255_v23 = vpop.f32.mrb[16].mxu1  ;;  %v1185_v24 = vpop.f32.mrb[17].mxu0 }
 0x17f   : > { %v1186_v25 = vadd.f32 %v1185_v24, %v1184_v21  ;;  %v1256_v26 = vpop.f32.mrb[17].mxu1 }
 0x180   : > { %v1257_v27 = vadd.f32 %v1256_v26, %v1255_v23 }
 0x181   : > { %v1187_v28 = vpop.f32.mrb[18].mxu0 }
 0x182   : > { %v630_v29 = vadd.f32 %v1257_v27, %v1186_v25  ;;  %v1258_v30 = vpop.f32.mrb[18].mxu1  ;;  %v1188_v31 = vpop.f32.mrb[19].mxu0 }
 0x183   : > { %v1189_v32 = vadd.f32 %v1188_v31, %v1187_v28  ;;  %v1259_v33 = vpop.f32.mrb[19].mxu1 }
 0x184   : > { %v1260_v34 = vadd.f32 %v1259_v33, %v1258_v30 }
 0x185   : > { %v1190_v35 = vpop.f32.mrb[20].mxu0 }
 0x186   : > { %v635_v36 = vadd.f32 %v1260_v34, %v1189_v32  ;;  %v1261_v38 = vpop.f32.mrb[20].mxu1  ;;  %v1191_v39 = vpop.f32.mrb[21].mxu0 }
 0x187   : > { %v1192_v40 = vadd.f32 %v1191_v39, %v1190_v35  ;;  %v1262_v41 = vpop.f32.mrb[21].mxu1 }
 0x188   : > { %v1263_v42 = vadd.f32 %v1262_v41, %v1261_v38 }
 0x189   : > { %v1193_v43 = vpop.f32.mrb[22].mxu0 }
 0x18a   : > { %v640_v45 = vadd.f32 %v1263_v42, %v1192_v40  ;;  %v1264_v46 = vpop.f32.mrb[22].mxu1  ;;  %v1194_v47 = vpop.f32.mrb[23].mxu0 }
 0x18b   : > { %v1195_v48 = vadd.f32 %v1194_v47, %v1193_v43  ;;  %v1265_v49 = vpop.f32.mrb[23].mxu1 }
 0x18c   : > { %v1266_v50 = vadd.f32 %v1265_v49, %v1264_v46 }
 0x18d   : > { %v1196_v52 = vpop.f32.mrb[24].mxu0 }
 0x18e   : > { %v1995_v53 = vadd.f32 %v1266_v50, %v1195_v48  ;;  %v1267_v54 = vpop.f32.mrb[24].mxu1  ;;  %v1197_v55 = vpop.f32.mrb[25].mxu0 }
 0x18f   : > { %v1198_v56 = vadd.f32 %v1197_v55, %v1196_v52  ;;  %v1268_v57 = vpop.f32.mrb[25].mxu1 }
 0x190   : > { %v1269_v59 = vadd.f32 %v1268_v57, %v1267_v54 }
 0x191   : > { %v1302_v60 = vpop.f32.mrb[26].mxu0 }
 0x192   : > { %v1997_v61 = vadd.f32 %v1269_v59, %v1198_v56  ;;  %v1323_v62 = vpop.f32.mrb[26].mxu1  ;;  %v1303_v63 = vpop.f32.mrb[27].mxu0 }
 0x193   : > { %v1304_v0 = vadd.f32 %v1303_v63, %v1302_v60  ;;  %v1324_v2 = vpop.f32.mrb[27].mxu1 }
 0x194   : > { %v1325_v4 = vadd.f32 %v1324_v2, %v1323_v62 }
 0x195   : > { %v720_v5 = vadd.f32 %v1304_v0, %v1981_v37  ;;  %v1305_v6 = vpop.f32.mrb[28].mxu0 }
 0x196   : > { %v755_v7 = vadd.f32 %v1325_v4, %v625_v22  ;;  %v1326_v9 = vpop.f32.mrb[28].mxu1  ;;  %v1306_v10 = vpop.f32.mrb[29].mxu0 }
 0x197   : > { %v790_v11 = vadd.f32 %v2003_v3, %v720_v5  ;;  %v1307_v12 = vadd.f32 %v1306_v10, %v1305_v6  ;;  %v1327_v13 = vpop.f32.mrb[29].mxu1 }
 0x198   : > { %v797_v14 = vadd.f32 %v2003_v3, %v755_v7  ;;  %v1328_v16 = vadd.f32 %v1327_v13, %v1326_v9 }
 0x199   : > { %804 = vst.msk [vmem:[%s2008_s30] sm:$0xff] %vm803_vm0, %v790_v11  ;;  %v725_v37 = vadd.f32 %v1307_v12, %v1983_v44  ;;  %v1308_v17 = vpop.f32.mrb[30].mxu0 }
 0x19a   : > { %811 = vst.msk [vmem:[%s2008_s30 + $0x38] sm:$0xff] %vm803_vm0, %v797_v14  ;;  %v760_v18 = vadd.f32 %v1328_v16, %v630_v29  ;;  %v1329_v19 = vpop.f32.mrb[30].mxu1  ;;  %v1309_v20 = vpop.f32.mrb[31].mxu0 }
 0x19b   : > { %v791_v21 = vadd.f32 %v2003_v3, %v725_v37  ;;  %v1310_v22 = vadd.f32 %v1309_v20, %v1308_v17  ;;  %v1330_v23 = vpop.f32.mrb[31].mxu1 }
 0x19c   : > { %v798_v24 = vadd.f32 %v2003_v3, %v760_v18  ;;  %v1331_v25 = vadd.f32 %v1330_v23, %v1329_v19 }
 0x19d   : > { %805 = vst.msk [vmem:[%s2008_s30 + $0x8] sm:$0xff] %vm803_vm0, %v791_v21  ;;  %v730_v26 = vadd.f32 %v1310_v22, %v1985_v51  ;;  %v1311_v44 = vpop.f32.mrb[32].mxu0 }
 0x19e   : > { %812 = vst.msk [vmem:[%s2008_s30 + $0x40] sm:$0xff] %vm803_vm0, %v798_v24  ;;  %v765_v27 = vadd.f32 %v1331_v25, %v635_v36  ;;  %v1332_v28 = vpop.f32.mrb[32].mxu1  ;;  %v1312_v29 = vpop.f32.mrb[33].mxu0 }
 0x19f   : > { %v792_v30 = vadd.f32 %v2003_v3, %v730_v26  ;;  %v1313_v31 = vadd.f32 %v1312_v29, %v1311_v44  ;;  %v1333_v32 = vpop.f32.mrb[33].mxu1 }
 0x1a0   : > { %v799_v33 = vadd.f32 %v2003_v3, %v765_v27  ;;  %v1334_v34 = vadd.f32 %v1333_v32, %v1332_v28 }
 0x1a1   : > { %806 = vst.msk [vmem:[%s2008_s30 + $0x10] sm:$0xff] %vm803_vm0, %v792_v30  ;;  %v735_v35 = vadd.f32 %v1313_v31, %v1987_v58  ;;  %v1314_v51 = vpop.f32.mrb[34].mxu0 }
 0x1a2   : > { %813 = vst.msk [vmem:[%s2008_s30 + $0x48] sm:$0xff] %vm803_vm0, %v799_v33  ;;  %v770_v38 = vadd.f32 %v1334_v34, %v640_v45  ;;  %v1335_v36 = vpop.f32.mrb[34].mxu1  ;;  %v1315_v39 = vpop.f32.mrb[35].mxu0 }
 0x1a3   : > { %v793_v40 = vadd.f32 %v2003_v3, %v735_v35  ;;  %v1316_v41 = vadd.f32 %v1315_v39, %v1314_v51  ;;  %v1336_v42 = vpop.f32.mrb[35].mxu1 }
 0x1a4   : > { %v800_v43 = vadd.f32 %v2003_v3, %v770_v38  ;;  %v1337_v46 = vadd.f32 %v1336_v42, %v1335_v36 }
 0x1a5   : > { %807 = vst.msk [vmem:[%s2008_s30 + $0x18] sm:$0xff] %vm803_vm0, %v793_v40  ;;  %v740_v47 = vadd.f32 %v1316_v41, %v1989_v1  ;;  %v1317_v58 = vpop.f32.mrb[36].mxu0 }
 0x1a6   : > { %814 = vst.msk [vmem:[%s2008_s30 + $0x50] sm:$0xff] %vm803_vm0, %v800_v43  ;;  %v775_v45 = vadd.f32 %v1337_v46, %v1995_v53  ;;  %v1338_v48 = vpop.f32.mrb[36].mxu1  ;;  %v1318_v49 = vpop.f32.mrb[37].mxu0 }
 0x1a7   : > { %v794_v50 = vadd.f32 %v2003_v3, %v740_v47  ;;  %v1319_v52 = vadd.f32 %v1318_v49, %v1317_v58  ;;  %v1339_v54 = vpop.f32.mrb[37].mxu1 }
 0x1a8   : > { %v801_v55 = vadd.f32 %v2003_v3, %v775_v45  ;;  %v1340_v56 = vadd.f32 %v1339_v54, %v1338_v48 }
 0x1a9   : > { %808 = vst.msk [vmem:[%s2008_s30 + $0x20] sm:$0xff] %vm803_vm0, %v794_v50  ;;  %v745_v1 = vadd.f32 %v1319_v52, %v1991_v8  ;;  %v1320_v57 = vpop.f32.mrb[38].mxu0 }
 0x1aa   : > { %815 = vst.msk [vmem:[%s2008_s30 + $0x58] sm:$0xff] %vm803_vm0, %v801_v55  ;;  %v780_v53 = vadd.f32 %v1340_v56, %v1997_v61  ;;  %v1321_v59 = vpop.f32.mrb[39].mxu0 }
 0x1ab   : > { %v795_v60 = vadd.f32 %v2003_v3, %v745_v1  ;;  %v1322_v62 = vadd.f32 %v1321_v59, %v1320_v57  ;;  %823 = sbr.rel (!%p2164_p6) target bundleno = 495 (0x1ef), region = 44 }
 0x1ac   : > { %v802_v63 = vadd.f32 %v2003_v3, %v780_v53 }
 0x1ad   : > { %809 = vst.msk [vmem:[%s2008_s30 + $0x28] sm:$0xff] %vm803_vm0, %v795_v60  ;;  %v750_v0 = vadd.f32 %v1322_v62, %v1993_v15 }
 0x1ae   : > { %816 = vst.msk [vmem:[%s2008_s30 + $0x60] sm:$0xff] %vm803_vm0, %v802_v63 }
 0x1af   : > { %v796_v2 = vadd.f32 %v2003_v3, %v750_v0 }
 0x1b1   : > { %810 = vst.msk [vmem:[%s2008_s30 + $0x30] sm:$0xff] %vm803_vm0, %v796_v2 }
 0x1b2   : > { %s2175_s9 = smov (!%p826_p7, %s825_s9), 13 }
 0x1b3   : > { %s1115_s12 = sshll.u32 %s2175_s9, 7 }
 0x1b4   : > { %p1118_p9 = scmp.eq.s32.totalorder %s1115_s12, 0 }
 0x1b5   : > { %1571 = sdivrem.u32 (!%p1118_p9), %s2175_s9, 13 }
 0x1b6   : > { %834 = sbr.rel (%p1118_p9) target bundleno = 495 (0x1ef), region = 48 }
 0x1be   : > { %s2068_s23 = spop.drf %1571 }
 0x1bf   : > { %p1119_p12 = scmp.le.s32.totalorder %s2068_s23, 0 }
 0x1c0   : > { %s2165_s16 = smov (!%p1119_p12), %s2062_s11  ;;  %s2166_s18 = smov (!%p1119_p12), %s2008_s30 }
 0x1c1   : > { %1047 = sbr.rel (%p1119_p12) target bundleno = 466 (0x1d2), region = 130  ;;  %s2077_s19 = smov (!%p1119_p12), 0  }
 0x1c2   : > { %s2079_s25 = smov (!%p1119_p12), 0  }
 0x1c8 LB: >> { %v922_v8 = vld [vmem:[%s1709_s18] sm:$0xff]  ;;  %v924_v15 = vld [vmem:[%s1709_s18 + $0x8] sm:$0xff]  ;;  %v926_v61 = vld [vmem:[%s1709_s18 + $0x10] sm:$0xff]  ;;  %s948_s28 = sadd.s32 1, %s1713_s19  ;;  %s916_s25 = sadd.s32 1, %s1717_s25   ;;  %s1717_s25 = sphi %s2079_s25, %s916_s25   ;;  %s1713_s19 = sphi %s2077_s19, %s2167_s19   ;;  %s1709_s18 = sphi %s2166_s18, %s953_s18   ;;  %s1705_s16 = sphi %s2165_s16, %s954_s16  }
 0x1c9   : >> { %923 = vst [vmem:[%s1705_s16] sm:$0xff] %v922_v8  ;;  %925 = vst [vmem:[%s1705_s16 + $0x8] sm:$0xff] %v924_v15  ;;  %v928_v3 = vld [vmem:[%s1709_s18 + $0x18] sm:$0xff]  ;;  %v930_v4 = vld [vmem:[%s1709_s18 + $0x20] sm:$0xff]  ;;  %p949_p0 = scmp.ge.s32.totalorder %s948_s28, %s2068_s23  ;;  %p915_p2 = scmp.ge.s32.totalorder %s916_s25, %s2068_s23 }
 0x1ca   : >> { %927 = vst [vmem:[%s1705_s16 + $0x10] sm:$0xff] %v926_v61  ;;  %v932_v5 = vld [vmem:[%s1709_s18 + $0x28] sm:$0xff]  ;;  %929 = vst [vmem:[%s1705_s16 + $0x18] sm:$0xff] %v928_v3  ;;  %v934_v6 = vld [vmem:[%s1709_s18 + $0x30] sm:$0xff] }
 0x1cb   : >> { %931 = vst [vmem:[%s1705_s16 + $0x20] sm:$0xff] %v930_v4  ;;  %933 = vst [vmem:[%s1705_s16 + $0x28] sm:$0xff] %v932_v5  ;;  %v936_v7 = vld [vmem:[%s1709_s18 + $0x38] sm:$0xff]  ;;  %v938_v9 = vld [vmem:[%s1709_s18 + $0x40] sm:$0xff]  ;;  %s2177_s28 = smov (%p949_p0, %s948_s28), 0  ;;  %918 = sbr.rel (!%p915_p2) target bundleno = 456 (0x1c8), region = 136 }
 0x1cc   : >> { %935 = vst [vmem:[%s1705_s16 + $0x30] sm:$0xff] %v934_v6  ;;  %937 = vst [vmem:[%s1705_s16 + $0x38] sm:$0xff] %v936_v7  ;;  %v940_v10 = vld [vmem:[%s1709_s18 + $0x48] sm:$0xff]  ;;  %v942_v11 = vld [vmem:[%s1709_s18 + $0x50] sm:$0xff]  ;;  %s951_s27 = smul.u32 104, %s2177_s28  ;;  %s2167_s19 = smov %s2177_s28 }
 0x1cd   : >> { %939 = vst [vmem:[%s1705_s16 + $0x40] sm:$0xff] %v938_v9  ;;  %v944_v12 = vld [vmem:[%s1709_s18 + $0x58] sm:$0xff]  ;;  %941 = vst [vmem:[%s1705_s16 + $0x48] sm:$0xff] %v940_v10  ;;  %v946_v13 = vld [vmem:[%s1709_s18 + $0x60] sm:$0xff] }
 0x1ce   : >> { %943 = vst [vmem:[%s1705_s16 + $0x50] sm:$0xff] %v942_v11  ;;  %945 = vst [vmem:[%s1705_s16 + $0x58] sm:$0xff] %v944_v12  ;;  %s953_s18 = scalar_lea.vmem %s2008_s30, %s951_s27 [#allocation6]  }
 0x1cf   : >> { %947 = vst [vmem:[%s1705_s16 + $0x60] sm:$0xff] %v946_v13  ;;  %s954_s16 = scalar_lea.vmem %s2062_s11, %s951_s27  }
 0x1d2 PF: > { %1573 = sdivrem.u32 %s2175_s9, 13 }
 0x1d3   : > { %s1120_s26 = smul.u32 104, %s2068_s23 }
 0x1d5   : > { %s959_s21 = scalar_lea.vmem %s2008_s30, %s1120_s26 [#allocation6]   ;;  %s961_s5 = scalar_lea.vmem %s2062_s11, %s1120_s26  }
 0x1db   : > { %s1574_s6 = spop.drf %1573 }
 0x1dc   : > { %p1122_p4 = scmp.le.s32.totalorder %s1574_s6, 0 }
 0x1dd   : > { %s1719_s8 = smov (!%p1122_p4), %s961_s5   ;;  %s1723_s22 = smov (!%p1122_p4), %s959_s21  }
 0x1de   : > { %1061 = sbr.rel (%p1122_p4) target bundleno = 495 (0x1ef), region = 141  ;;  %s1727_s24 = smov (!%p1122_p4), 0  }
 0x1df   : > { %s1731_s29 = smov (!%p1122_p4), 0  }
 0x1e5 LB: >> { %v971_v14 = vld [vmem:[%s1725_s22] sm:$0xff]  ;;  %s973_s4 = sadd.s32 1, %s1729_s24  ;;  %s965_s29 = sadd.s32 1, %s1733_s29   ;;  %s1733_s29 = sphi %s1731_s29, %s965_s29   ;;  %s1729_s24 = sphi %s1727_s24, %s1728_s24   ;;  %s1725_s22 = sphi %s1723_s22, %s978_s22   ;;  %s1721_s8 = sphi %s1719_s8, %s979_s8  }
 0x1e6   : >> { %972 = vst [vmem:[%s1721_s8] sm:$0xff] %v971_v14  ;;  %p974_p8 = scmp.ge.s32.totalorder %s973_s4, %s1574_s6  ;;  %p964_p10 = scmp.ge.s32.totalorder %s965_s29, %s1574_s6 }
 0x1e8   : >> { %s2179_s4 = smov (%p974_p8, %s973_s4), 0  ;;  %967 = sbr.rel (!%p964_p10) target bundleno = 485 (0x1e5), region = 147 }
 0x1e9   : >> { %s1123_s30 = sshll.u32 %s2179_s4, 3  ;;  %s1728_s24 = smov %s2179_s4  }
 0x1ea   : >> { %s978_s22 = scalar_lea.vmem %s959_s21, %s1123_s30 [#allocation6]   ;;  %s979_s8 = scalar_lea.vmem %s961_s5, %s1123_s30  }
 0x1ef PF: > { %p14_p13 = scmp.ge.s32.totalorder %s1783_s17, 4   ;;  %s2168_s12 = smov %s1693_s13 }
 0x1f0   : > { %s2169_s13 = smov %s1697_s14  ;;  %s2170_s14 = smov %s1793_s20 }
 0x1f1   : > { %s2171_s15 = smov %s1783_s17  ;;  %16 = sbr.rel (!%p14_p13) target bundleno = 4 (0x4), region = 158 }
 0x1f8   :  { %995 = vsyncpa [#allocation3], 1 }
 0x1f9   :  { %997 = vsyncpa [#allocation3 + $0x1], 1 }
 0x1fa   :  { %998 = vsyncpa [#allocation5], 1 }

</bundles_post_ra>
